<compile_context>
chip_gen: v6e
topology: v6e:2x2x1
jax: 0.10.0
libtpu: 0.0.40
codegen_flags: <defaults>
</compile_context>

<pallas_src>
import functools

import jax
import jax.numpy as jnp
from jax import lax
from jax.experimental import pallas as pl
from jax.experimental.pallas import tpu as pltpu


def lstm_kernel(x_ref, wx_ref, wh_ref, b_ref, h0_ref, c0_ref,
                out_ref, cT_ref,
                h_sc, c_sc, gx_sc, *,
                n_hid, block_t, unroll, compute_dtype):
    ti = pl.program_id(1)  # time-block index (sequential "arbitrary" axis)

    # Load the (possibly user-provided) initial recurrent state at t == 0.
    @pl.when(ti == 0)
    def _():
        h_sc[...] = h0_ref[...].astype(h_sc.dtype)
        c_sc[...] = c0_ref[...].astype(c_sc.dtype)

    block_b = h_sc.shape[0]
    n_inp = x_ref.shape[-1]

    # ---- Hoisted input projection -----------------------------------------
    # One batched MXU dot for the whole time block: M = block_t * block_b rows
    # instead of block_b rows per step, and no per-step lane-axis concatenate.
    x_blk = x_ref[...].reshape(block_t * block_b, n_inp).astype(compute_dtype)
    gx = jnp.dot(x_blk, wx_ref[...].astype(compute_dtype),
                 preferred_element_type=jnp.float32)
    gx = gx + b_ref[...]                                   # (M, 4H) + (1, 4H)
    gx_sc[...] = gx.reshape(block_t, block_b, 4 * n_hid)

    wh = wh_ref[...].astype(compute_dtype)                 # loop-invariant load

    def step(s, carry):
        h_prev, c_prev = carry
        # Recurrent path: one clean (B, H) x (H, 4H) dot + precomputed x-gates.
        gates = gx_sc[s] + jnp.dot(h_prev.astype(compute_dtype), wh,
                                   preferred_element_type=jnp.float32)
        # Slice before activating once 4H exceeds one vreg lane-width; at
        # 4H <= 128 the full-width sigmoid is the same single EUP pass.
        sig_src = gates if 4 * n_hid <= 128 else gates[:, :3 * n_hid]
        sig = jax.nn.sigmoid(sig_src)
        i_t = sig[:, 0 * n_hid:1 * n_hid]
        f_t = sig[:, 1 * n_hid:2 * n_hid]
        o_t = sig[:, 2 * n_hid:3 * n_hid]
        c_tilde = jnp.tanh(gates[:, 3 * n_hid:4 * n_hid])
        c_new = f_t * c_prev + i_t * c_tilde
        h_new = o_t * jnp.tanh(c_new)
        out_ref[s] = h_new.astype(out_ref.dtype)           # VMEM store; HBM
        return h_new, c_new                                # writeback once/block

    h_fin, c_fin = lax.fori_loop(0, block_t, step, (h_sc[...], c_sc[...]),
                                 unroll=unroll)
    h_sc[...] = h_fin
    c_sc[...] = c_fin

    # Final cell state: constant-block-index output stays VMEM-resident across
    # the time grid; write it only on the last time block.
    @pl.when(ti == pl.num_programs(1) - 1)
    def _():
        cT_ref[...] = c_fin.astype(cT_ref.dtype)


def _pick_time_block(T, max_block=32):
    """Largest divisor of T that is <= max_block (falls back to 1).

    TODO(synk): for T with no divisor <= max_block (e.g. prime T), pad T or
    support a ragged final block instead of degrading to block_t == 1.
    """
    for tt in range(min(T, max_block), 0, -1):
        if T % tt == 0:
            return tt
    return 1


def _pick_batch_block(B):
    """Split the 'parallel' batch axis into >=2 blocks once B >= 16 so v7x's
    second TensorCore can be used; never drop below 8 sublane rows."""
    if B >= 16 and B % 2 == 0 and (B // 2) % 8 == 0:
        return B // 2
    return B


def _vmem_limit_bytes(block_t, block_b, n_inp, n_hid, compute_itemsize=4):
    """Budget = pipelined blocks (2x) + single-buffered weights + scratch."""
    f32 = 4
    x_blk = 2 * block_t * block_b * n_inp * f32            # double-buffered in
    out_blk = 2 * block_t * block_b * n_hid * f32          # double-buffered out
    weights = (n_inp + n_hid) * 4 * n_hid * compute_itemsize  # single-buffered
    bias = 4 * n_hid * f32
    h0c0 = 2 * 2 * block_b * n_hid * f32                   # double-buffered h0/c0
    cT = 2 * block_b * n_hid * f32
    scratch = (2 * block_b * n_hid + block_t * block_b * 4 * n_hid) * f32
    need = x_blk + out_blk + weights + bias + h0c0 + cT + scratch
    # 2x headroom for compiler temporaries, clamped to stay under v7x's 64 MiB.
    return int(min(max(2 * need, 16 * 2 ** 20), 48 * 2 ** 20))


@functools.partial(jax.jit, static_argnames=("compute_dtype",))
def lstm_forward(inputs, wx, wh, b, H_C_t=None, compute_dtype=jnp.float32):
    """inputs: (B, T, n_inp); wx: (n_inp, 4H); wh: (H, 4H); b: (1, 4H).

    Gate order along the 4H axis is [i, f, o, c].  Returns
    (outputs (B, T, H), (H_T, C_T)), matching lstm1.forward.
    """
    B, T, n_inp = inputs.shape
    n_hid = wh.shape[0]
    assert wx.shape == (n_inp, 4 * n_hid) and b.shape == (1, 4 * n_hid)

    if H_C_t is None:
        h0 = jnp.zeros((B, n_hid), jnp.float32)
        c0 = jnp.zeros((B, n_hid), jnp.float32)
    else:
        h0, c0 = H_C_t
        h0 = h0.astype(jnp.float32)
        c0 = c0.astype(jnp.float32)

    block_t = _pick_time_block(T)
    nt = T // block_t
    block_b = _pick_batch_block(B)
    nb = B // block_b
    # Cap the unroll so the h/c/gates live set does not spill the 64-vreg file
    # at large n_hid; block_t stays large for DMA / writeback amortization.
    unroll = min(block_t, 8)

    # bf16 weights halve weight VMEM and use the bf16-native MXU at production
    # sizes; default stays f32 (holds the 1e-5 tolerance, safe on v5e).
    wx = wx.astype(compute_dtype)
    wh = wh.astype(compute_dtype)

    # Time-major layout so the kernel slices the leading time axis.
    # TODO(synk): for long sequences accept time-major I/O end-to-end to avoid
    # these two XLA transposes (a full HBM round trip each at production T*B*H).
    x_tmajor = jnp.swapaxes(inputs, 0, 1)  # (T, B, n_inp)

    kernel = functools.partial(lstm_kernel, n_hid=n_hid, block_t=block_t,
                               unroll=unroll, compute_dtype=compute_dtype)

    # Grid-invariant weights / bias: single-buffered so they are not doubled
    # in VMEM (constant index_map inputs are double-buffered by default).
    def inv_spec(shape):
        return pl.BlockSpec(shape, lambda bi, ti: (0, 0),
                            pipeline_mode=pl.Buffered(1))

    # TODO(synk): if n_hid stays < 128 and the writeback (not the recurrence)
    # becomes the bottleneck, emit a lane-dense (T, B*n_hid) output instead.
    out_tmajor, c_T = pl.pallas_call(
        kernel,
        out_shape=(
            jax.ShapeDtypeStruct((T, B, n_hid), jnp.float32),
            jax.ShapeDtypeStruct((B, n_hid), jnp.float32),
        ),
        grid_spec=pltpu.PrefetchScalarGridSpec(
            num_scalar_prefetch=0,
            grid=(nb, nt),
            in_specs=[
                pl.BlockSpec((block_t, block_b, n_inp),
                             lambda bi, ti: (ti, bi, 0)),
                inv_spec((n_inp, 4 * n_hid)),            # Wx (single-buffered)
                inv_spec((n_hid, 4 * n_hid)),            # Wh (single-buffered)
                inv_spec((1, 4 * n_hid)),                # bias
                pl.BlockSpec((block_b, n_hid), lambda bi, ti: (bi, 0)),  # H_0
                pl.BlockSpec((block_b, n_hid), lambda bi, ti: (bi, 0)),  # C_0
            ],
            out_specs=(
                pl.BlockSpec((block_t, block_b, n_hid),
                             lambda bi, ti: (ti, bi, 0)),
                pl.BlockSpec((block_b, n_hid), lambda bi, ti: (bi, 0)),
            ),
            scratch_shapes=[
                pltpu.VMEM((block_b, n_hid), jnp.float32),               # H_t
                pltpu.VMEM((block_b, n_hid), jnp.float32),               # C_t
                pltpu.VMEM((block_t, block_b, 4 * n_hid), jnp.float32),  # x-gates
            ],
        ),
        compiler_params=pltpu.CompilerParams(
            dimension_semantics=("parallel", "arbitrary"),  # time is sequential
            vmem_limit_bytes=_vmem_limit_bytes(
                block_t, block_b, n_inp, n_hid,
                compute_itemsize=jnp.dtype(compute_dtype).itemsize),
        ),
    )(x_tmajor, wx, wh, b, h0, c0)

    outputs = jnp.swapaxes(out_tmajor, 0, 1)  # (B, T, n_hid)
    h_T = outputs[:, -1, :]                   # final hidden state = last output
    return outputs, (h_T, c_T)


def lstm_reference(inputs, wx, wh, b, H_C_t=None):
    """Pure-JAX reference matching the PyTorch module semantics."""
    B, T, _ = inputs.shape
    n_hid = wh.shape[0]
    if H_C_t is None:
        h = jnp.zeros((B, n_hid), jnp.float32)
        c = jnp.zeros((B, n_hid), jnp.float32)
    else:
        h, c = H_C_t
    outs = []
    for t in range(T):
        x_t = inputs[:, t, :]
        gates = x_t @ wx + h @ wh + b
        i_t = jax.nn.sigmoid(gates[:, 0 * n_hid:1 * n_hid])
        f_t = jax.nn.sigmoid(gates[:, 1 * n_hid:2 * n_hid])
        o_t = jax.nn.sigmoid(gates[:, 2 * n_hid:3 * n_hid])
        c_tilde = jnp.tanh(gates[:, 3 * n_hid:4 * n_hid])
        c = f_t * c + i_t * c_tilde
        h = o_t * jnp.tanh(c)
        outs.append(h)
    return jnp.stack(outs, axis=1), (h, c)


def init_params(key, n_inp, n_hid):
    """Mirror lstm1.__init__: randn(shape) / (shape[0]*shape[1]); zero biases."""
    keys = jax.random.split(key, 8)
    scale_x = 1.0 / (n_inp * n_hid)
    scale_h = 1.0 / (n_hid * n_hid)
    W_x = [jax.random.normal(keys[k], (n_inp, n_hid), jnp.float32) * scale_x
           for k in range(4)]
    W_h = [jax.random.normal(keys[4 + k], (n_hid, n_hid), jnp.float32) * scale_h
           for k in range(4)]
    b = [jnp.zeros((n_hid,), jnp.float32) for _ in range(4)]
    # Gate order [i, f, o, c] along the 4H axis.
    wx = jnp.concatenate(W_x, axis=1)              # (n_inp, 4H)
    wh = jnp.concatenate(W_h, axis=1)              # (H, 4H)
    bb = jnp.concatenate(b, axis=0)[None, :]       # (1, 4H)
    return wx, wh, bb


if __name__ == "__main__":
    B, T, N_INP, N_HID = 8, 8, 16, 32

    key = jax.random.PRNGKey(0)
    k_param, k_x, k_h0, k_c0 = jax.random.split(key, 4)
    wx, wh, bb = init_params(k_param, N_INP, N_HID)
    x = jax.random.normal(k_x, (B, T, N_INP), jnp.float32)

    # Default zero initial state (the H_C_t=None path of lstm1.forward).
    outputs, (h_T, c_T) = lstm_forward(x, wx, wh, bb)
    jax.block_until_ready((outputs, h_T, c_T))
    ref_out, (ref_h, ref_c) = lstm_reference(x, wx, wh, bb)
    assert jnp.allclose(outputs, ref_out, atol=1e-5, rtol=1e-5)
    assert jnp.allclose(h_T, ref_h, atol=1e-5, rtol=1e-5)
    assert jnp.allclose(c_T, ref_c, atol=1e-5, rtol=1e-5)

    # User-provided (H_0, C_0) path.
    h0 = 0.1 * jax.random.normal(k_h0, (B, N_HID), jnp.float32)
    c0 = 0.1 * jax.random.normal(k_c0, (B, N_HID), jnp.float32)
    out2, (h2, c2) = lstm_forward(x, wx, wh, bb, (h0, c0))
    jax.block_until_ready((out2, h2, c2))
    ref2, (rh2, rc2) = lstm_reference(x, wx, wh, bb, (h0, c0))
    assert jnp.allclose(out2, ref2, atol=1e-5, rtol=1e-5)
    assert jnp.allclose(h2, rh2, atol=1e-5, rtol=1e-5)
    assert jnp.allclose(c2, rc2, atol=1e-5, rtol=1e-5)

    print("KERNEL_OK")
</pallas_src>

<mosaic_0001>
module attributes {stable_mosaic.version = 11 : i64} {
  func.func @lstm_kernel(%arg0: i32, %arg1: i32, %arg2: memref<8x8x16xf32, #tpu.memory_space<vmem>>, %arg3: memref<16x128xf32, #tpu.memory_space<vmem>>, %arg4: memref<32x128xf32, #tpu.memory_space<vmem>>, %arg5: memref<1x128xf32, #tpu.memory_space<vmem>>, %arg6: memref<8x32xf32, #tpu.memory_space<vmem>>, %arg7: memref<8x32xf32, #tpu.memory_space<vmem>>, %arg8: memref<8x8x32xf32, #tpu.memory_space<vmem>>, %arg9: memref<8x32xf32, #tpu.memory_space<vmem>>, %arg10: memref<8x32xf32, #tpu.memory_space<vmem>>, %arg11: memref<8x32xf32, #tpu.memory_space<vmem>>, %arg12: memref<8x8x128xf32, #tpu.memory_space<vmem>>) attributes {dimension_semantics = [#tpu.dimension_semantics<parallel>, #tpu.dimension_semantics<arbitrary>], iteration_bounds = array<i64: 1, 1>, scalar_prefetch = 0 : i64, scratch_operands = 3 : i64, tpu.core_type = #tpu.core_type<tc>, window_params = [{transform_indices = @transform_0, window_bounds = array<i64: 8, 8, 16>}, {pipeline_mode = #tpu.pipeline_mode<synchronous>, transform_indices = @transform_1, window_bounds = array<i64: 16, 128>}, {pipeline_mode = #tpu.pipeline_mode<synchronous>, transform_indices = @transform_2, window_bounds = array<i64: 32, 128>}, {pipeline_mode = #tpu.pipeline_mode<synchronous>, transform_indices = @transform_3, window_bounds = array<i64: 1, 128>}, {transform_indices = @transform_4, window_bounds = array<i64: 8, 32>}, {transform_indices = @transform_5, window_bounds = array<i64: 8, 32>}, {transform_indices = @transform_6, window_bounds = array<i64: 8, 8, 32>}, {transform_indices = @transform_7, window_bounds = array<i64: 8, 32>}]} {
    %c0_i32 = arith.constant 0 : i32
    %0 = arith.cmpi eq, %arg1, %c0_i32 : i32
    %1 = arith.extui %0 : i1 to i32
    %c0_i32_0 = arith.constant 0 : i32
    %2 = arith.cmpi ne, %1, %c0_i32_0 : i32
    scf.if %2 {
      %c0_71 = arith.constant 0 : index
      %c0_72 = arith.constant 0 : index
      %212 = vector.load %arg6[%c0_71, %c0_72] : memref<8x32xf32, #tpu.memory_space<vmem>>, vector<8x32xf32>
      %c0_73 = arith.constant 0 : index
      %c0_74 = arith.constant 0 : index
      %213 = vector.load %arg10[%c0_73, %c0_74] : memref<8x32xf32, #tpu.memory_space<vmem>>, vector<8x32xf32>
      tpu.vector_store %arg10[%c0_73, %c0_74], %212 {strides = array<i32>} : memref<8x32xf32, #tpu.memory_space<vmem>>, vector<8x32xf32>,
      %c0_75 = arith.constant 0 : index
      %c0_76 = arith.constant 0 : index
      %214 = vector.load %arg7[%c0_75, %c0_76] : memref<8x32xf32, #tpu.memory_space<vmem>>, vector<8x32xf32>
      %c0_77 = arith.constant 0 : index
      %c0_78 = arith.constant 0 : index
      %215 = vector.load %arg11[%c0_77, %c0_78] : memref<8x32xf32, #tpu.memory_space<vmem>>, vector<8x32xf32>
      tpu.vector_store %arg11[%c0_77, %c0_78], %214 {strides = array<i32>} : memref<8x32xf32, #tpu.memory_space<vmem>>, vector<8x32xf32>,
    } else {
    }
    %c0 = arith.constant 0 : index
    %c0_1 = arith.constant 0 : index
    %c0_2 = arith.constant 0 : index
    %3 = vector.load %arg2[%c0, %c0_1, %c0_2] : memref<8x8x16xf32, #tpu.memory_space<vmem>>, vector<8x8x16xf32>
    %4 = vector.shape_cast %3 : vector<8x8x16xf32> to vector<64x16xf32>
    %c0_3 = arith.constant 0 : index
    %c0_4 = arith.constant 0 : index
    %5 = vector.load %arg3[%c0_3, %c0_4] : memref<16x128xf32, #tpu.memory_space<vmem>>, vector<16x128xf32>
    %cst = arith.constant dense<0.000000e+00> : vector<64x128xf32>
    %6 = tpu.matmul %4, %5, %cst {dimension_numbers = #tpu.dot_dimension_numbers<[1], [0], [0], [1], [0, 0, 1, 1], [], []>} : vector<64x16xf32>, vector<16x128xf32>, vector<64x128xf32> -> vector<64x128xf32>
    %c0_5 = arith.constant 0 : index
    %c0_6 = arith.constant 0 : index
    %7 = vector.load %arg5[%c0_5, %c0_6] : memref<1x128xf32, #tpu.memory_space<vmem>>, vector<1x128xf32>
    %8 = vector.broadcast %7 : vector<1x128xf32> to vector<64x128xf32>
    %9 = arith.addf %6, %8 : vector<64x128xf32>
    %10 = vector.shape_cast %9 : vector<64x128xf32> to vector<8x8x128xf32>
    %c0_7 = arith.constant 0 : index
    %c0_8 = arith.constant 0 : index
    %c0_9 = arith.constant 0 : index
    %11 = vector.load %arg12[%c0_7, %c0_8, %c0_9] : memref<8x8x128xf32, #tpu.memory_space<vmem>>, vector<8x8x128xf32>
    tpu.vector_store %arg12[%c0_7, %c0_8, %c0_9], %10 {strides = array<i32>} : memref<8x8x128xf32, #tpu.memory_space<vmem>>, vector<8x8x128xf32>,
    %c0_10 = arith.constant 0 : index
    %c0_11 = arith.constant 0 : index
    %12 = vector.load %arg4[%c0_10, %c0_11] : memref<32x128xf32, #tpu.memory_space<vmem>>, vector<32x128xf32>
    %c0_12 = arith.constant 0 : index
    %c0_13 = arith.constant 0 : index
    %13 = vector.load %arg10[%c0_12, %c0_13] : memref<8x32xf32, #tpu.memory_space<vmem>>, vector<8x32xf32>
    %c0_14 = arith.constant 0 : index
    %c0_15 = arith.constant 0 : index
    %14 = vector.load %arg11[%c0_14, %c0_15] : memref<8x32xf32, #tpu.memory_space<vmem>>, vector<8x32xf32>
    %c0_i32_16 = arith.constant 0 : i32
    %15 = arith.index_cast %c0_i32_16 : i32 to index
    %c0_17 = arith.constant 0 : index
    %c0_18 = arith.constant 0 : index
    %16 = vector.load %arg12[%15, %c0_17, %c0_18] : memref<8x8x128xf32, #tpu.memory_space<vmem>>, vector<1x8x128xf32>
    %17 = vector.shape_cast %16 : vector<1x8x128xf32> to vector<8x128xf32>
    %cst_19 = arith.constant dense<0.000000e+00> : vector<8x128xf32>
    %18 = tpu.matmul %13, %12, %cst_19 {dimension_numbers = #tpu.dot_dimension_numbers<[1], [0], [0], [1], [0, 0, 1, 1], [], []>} : vector<8x32xf32>, vector<32x128xf32>, vector<8x128xf32> -> vector<8x128xf32>
    %19 = arith.addf %17, %18 : vector<8x128xf32>
    %20 = arith.negf %19 : vector<8x128xf32>
    %21 = math.exp %20 : vector<8x128xf32>
    %cst_20 = arith.constant 1.000000e+00 : f32
    %22 = vector.broadcast %cst_20 : f32 to vector<8x128xf32>
    %23 = arith.addf %22, %21 : vector<8x128xf32>
    %24 = arith.divf %22, %23 : vector<8x128xf32>
    %25 = vector.extract_strided_slice %24 {offsets = [0, 0], sizes = [8, 32], strides = [1, 1]} : vector<8x128xf32> to vector<8x32xf32>
    %26 = vector.extract_strided_slice %24 {offsets = [0, 32], sizes = [8, 32], strides = [1, 1]} : vector<8x128xf32> to vector<8x32xf32>
    %27 = vector.extract_strided_slice %24 {offsets = [0, 64], sizes = [8, 32], strides = [1, 1]} : vector<8x128xf32> to vector<8x32xf32>
    %28 = vector.extract_strided_slice %19 {offsets = [0, 96], sizes = [8, 32], strides = [1, 1]} : vector<8x128xf32> to vector<8x32xf32>
    %29 = math.tanh %28 : vector<8x32xf32>
    %30 = arith.mulf %26, %14 : vector<8x32xf32>
    %31 = arith.mulf %25, %29 : vector<8x32xf32>
    %32 = arith.addf %30, %31 : vector<8x32xf32>
    %33 = math.tanh %32 : vector<8x32xf32>
    %34 = arith.mulf %27, %33 : vector<8x32xf32>
    %35 = arith.index_cast %c0_i32_16 : i32 to index
    %c0_21 = arith.constant 0 : index
    %c0_22 = arith.constant 0 : index
    %36 = vector.load %arg8[%35, %c0_21, %c0_22] : memref<8x8x32xf32, #tpu.memory_space<vmem>>, vector<1x8x32xf32>
    %37 = vector.shape_cast %36 : vector<1x8x32xf32> to vector<8x32xf32>
    %38 = vector.shape_cast %34 : vector<8x32xf32> to vector<1x8x32xf32>
    tpu.vector_store %arg8[%35, %c0_21, %c0_22], %38 {strides = array<i32>} : memref<8x8x32xf32, #tpu.memory_space<vmem>>, vector<1x8x32xf32>,
    %c1_i32 = arith.constant 1 : i32
    %39 = arith.index_cast %c1_i32 : i32 to index
    %c0_23 = arith.constant 0 : index
    %c0_24 = arith.constant 0 : index
    %40 = vector.load %arg12[%39, %c0_23, %c0_24] : memref<8x8x128xf32, #tpu.memory_space<vmem>>, vector<1x8x128xf32>
    %41 = vector.shape_cast %40 : vector<1x8x128xf32> to vector<8x128xf32>
    %cst_25 = arith.constant dense<0.000000e+00> : vector<8x128xf32>
    %42 = tpu.matmul %34, %12, %cst_25 {dimension_numbers = #tpu.dot_dimension_numbers<[1], [0], [0], [1], [0, 0, 1, 1], [], []>} : vector<8x32xf32>, vector<32x128xf32>, vector<8x128xf32> -> vector<8x128xf32>
    %43 = arith.addf %41, %42 : vector<8x128xf32>
    %44 = arith.negf %43 : vector<8x128xf32>
    %45 = math.exp %44 : vector<8x128xf32>
    %cst_26 = arith.constant 1.000000e+00 : f32
    %46 = vector.broadcast %cst_26 : f32 to vector<8x128xf32>
    %47 = arith.addf %46, %45 : vector<8x128xf32>
    %48 = arith.divf %46, %47 : vector<8x128xf32>
    %49 = vector.extract_strided_slice %48 {offsets = [0, 0], sizes = [8, 32], strides = [1, 1]} : vector<8x128xf32> to vector<8x32xf32>
    %50 = vector.extract_strided_slice %48 {offsets = [0, 32], sizes = [8, 32], strides = [1, 1]} : vector<8x128xf32> to vector<8x32xf32>
    %51 = vector.extract_strided_slice %48 {offsets = [0, 64], sizes = [8, 32], strides = [1, 1]} : vector<8x128xf32> to vector<8x32xf32>
    %52 = vector.extract_strided_slice %43 {offsets = [0, 96], sizes = [8, 32], strides = [1, 1]} : vector<8x128xf32> to vector<8x32xf32>
    %53 = math.tanh %52 : vector<8x32xf32>
    %54 = arith.mulf %50, %32 : vector<8x32xf32>
    %55 = arith.mulf %49, %53 : vector<8x32xf32>
    %56 = arith.addf %54, %55 : vector<8x32xf32>
    %57 = math.tanh %56 : vector<8x32xf32>
    %58 = arith.mulf %51, %57 : vector<8x32xf32>
    %59 = arith.index_cast %c1_i32 : i32 to index
    %c0_27 = arith.constant 0 : index
    %c0_28 = arith.constant 0 : index
    %60 = vector.load %arg8[%59, %c0_27, %c0_28] : memref<8x8x32xf32, #tpu.memory_space<vmem>>, vector<1x8x32xf32>
    %61 = vector.shape_cast %60 : vector<1x8x32xf32> to vector<8x32xf32>
    %62 = vector.shape_cast %58 : vector<8x32xf32> to vector<1x8x32xf32>
    tpu.vector_store %arg8[%59, %c0_27, %c0_28], %62 {strides = array<i32>} : memref<8x8x32xf32, #tpu.memory_space<vmem>>, vector<1x8x32xf32>,
    %c2_i32 = arith.constant 2 : i32
    %63 = arith.index_cast %c2_i32 : i32 to index
    %c0_29 = arith.constant 0 : index
    %c0_30 = arith.constant 0 : index
    %64 = vector.load %arg12[%63, %c0_29, %c0_30] : memref<8x8x128xf32, #tpu.memory_space<vmem>>, vector<1x8x128xf32>
    %65 = vector.shape_cast %64 : vector<1x8x128xf32> to vector<8x128xf32>
    %cst_31 = arith.constant dense<0.000000e+00> : vector<8x128xf32>
    %66 = tpu.matmul %58, %12, %cst_31 {dimension_numbers = #tpu.dot_dimension_numbers<[1], [0], [0], [1], [0, 0, 1, 1], [], []>} : vector<8x32xf32>, vector<32x128xf32>, vector<8x128xf32> -> vector<8x128xf32>
    %67 = arith.addf %65, %66 : vector<8x128xf32>
    %68 = arith.negf %67 : vector<8x128xf32>
    %69 = math.exp %68 : vector<8x128xf32>
    %cst_32 = arith.constant 1.000000e+00 : f32
    %70 = vector.broadcast %cst_32 : f32 to vector<8x128xf32>
    %71 = arith.addf %70, %69 : vector<8x128xf32>
    %72 = arith.divf %70, %71 : vector<8x128xf32>
    %73 = vector.extract_strided_slice %72 {offsets = [0, 0], sizes = [8, 32], strides = [1, 1]} : vector<8x128xf32> to vector<8x32xf32>
    %74 = vector.extract_strided_slice %72 {offsets = [0, 32], sizes = [8, 32], strides = [1, 1]} : vector<8x128xf32> to vector<8x32xf32>
    %75 = vector.extract_strided_slice %72 {offsets = [0, 64], sizes = [8, 32], strides = [1, 1]} : vector<8x128xf32> to vector<8x32xf32>
    %76 = vector.extract_strided_slice %67 {offsets = [0, 96], sizes = [8, 32], strides = [1, 1]} : vector<8x128xf32> to vector<8x32xf32>
    %77 = math.tanh %76 : vector<8x32xf32>
    %78 = arith.mulf %74, %56 : vector<8x32xf32>
    %79 = arith.mulf %73, %77 : vector<8x32xf32>
    %80 = arith.addf %78, %79 : vector<8x32xf32>
    %81 = math.tanh %80 : vector<8x32xf32>
    %82 = arith.mulf %75, %81 : vector<8x32xf32>
    %83 = arith.index_cast %c2_i32 : i32 to index
    %c0_33 = arith.constant 0 : index
    %c0_34 = arith.constant 0 : index
    %84 = vector.load %arg8[%83, %c0_33, %c0_34] : memref<8x8x32xf32, #tpu.memory_space<vmem>>, vector<1x8x32xf32>
    %85 = vector.shape_cast %84 : vector<1x8x32xf32> to vector<8x32xf32>
    %86 = vector.shape_cast %82 : vector<8x32xf32> to vector<1x8x32xf32>
    tpu.vector_store %arg8[%83, %c0_33, %c0_34], %86 {strides = array<i32>} : memref<8x8x32xf32, #tpu.memory_space<vmem>>, vector<1x8x32xf32>,
    %c3_i32 = arith.constant 3 : i32
    %87 = arith.index_cast %c3_i32 : i32 to index
    %c0_35 = arith.constant 0 : index
    %c0_36 = arith.constant 0 : index
    %88 = vector.load %arg12[%87, %c0_35, %c0_36] : memref<8x8x128xf32, #tpu.memory_space<vmem>>, vector<1x8x128xf32>
    %89 = vector.shape_cast %88 : vector<1x8x128xf32> to vector<8x128xf32>
    %cst_37 = arith.constant dense<0.000000e+00> : vector<8x128xf32>
    %90 = tpu.matmul %82, %12, %cst_37 {dimension_numbers = #tpu.dot_dimension_numbers<[1], [0], [0], [1], [0, 0, 1, 1], [], []>} : vector<8x32xf32>, vector<32x128xf32>, vector<8x128xf32> -> vector<8x128xf32>
    %91 = arith.addf %89, %90 : vector<8x128xf32>
    %92 = arith.negf %91 : vector<8x128xf32>
    %93 = math.exp %92 : vector<8x128xf32>
    %cst_38 = arith.constant 1.000000e+00 : f32
    %94 = vector.broadcast %cst_38 : f32 to vector<8x128xf32>
    %95 = arith.addf %94, %93 : vector<8x128xf32>
    %96 = arith.divf %94, %95 : vector<8x128xf32>
    %97 = vector.extract_strided_slice %96 {offsets = [0, 0], sizes = [8, 32], strides = [1, 1]} : vector<8x128xf32> to vector<8x32xf32>
    %98 = vector.extract_strided_slice %96 {offsets = [0, 32], sizes = [8, 32], strides = [1, 1]} : vector<8x128xf32> to vector<8x32xf32>
    %99 = vector.extract_strided_slice %96 {offsets = [0, 64], sizes = [8, 32], strides = [1, 1]} : vector<8x128xf32> to vector<8x32xf32>
    %100 = vector.extract_strided_slice %91 {offsets = [0, 96], sizes = [8, 32], strides = [1, 1]} : vector<8x128xf32> to vector<8x32xf32>
    %101 = math.tanh %100 : vector<8x32xf32>
    %102 = arith.mulf %98, %80 : vector<8x32xf32>
    %103 = arith.mulf %97, %101 : vector<8x32xf32>
    %104 = arith.addf %102, %103 : vector<8x32xf32>
    %105 = math.tanh %104 : vector<8x32xf32>
    %106 = arith.mulf %99, %105 : vector<8x32xf32>
    %107 = arith.index_cast %c3_i32 : i32 to index
    %c0_39 = arith.constant 0 : index
    %c0_40 = arith.constant 0 : index
    %108 = vector.load %arg8[%107, %c0_39, %c0_40] : memref<8x8x32xf32, #tpu.memory_space<vmem>>, vector<1x8x32xf32>
    %109 = vector.shape_cast %108 : vector<1x8x32xf32> to vector<8x32xf32>
    %110 = vector.shape_cast %106 : vector<8x32xf32> to vector<1x8x32xf32>
    tpu.vector_store %arg8[%107, %c0_39, %c0_40], %110 {strides = array<i32>} : memref<8x8x32xf32, #tpu.memory_space<vmem>>, vector<1x8x32xf32>,
    %c4_i32 = arith.constant 4 : i32
    %111 = arith.index_cast %c4_i32 : i32 to index
    %c0_41 = arith.constant 0 : index
    %c0_42 = arith.constant 0 : index
    %112 = vector.load %arg12[%111, %c0_41, %c0_42] : memref<8x8x128xf32, #tpu.memory_space<vmem>>, vector<1x8x128xf32>
    %113 = vector.shape_cast %112 : vector<1x8x128xf32> to vector<8x128xf32>
    %cst_43 = arith.constant dense<0.000000e+00> : vector<8x128xf32>
    %114 = tpu.matmul %106, %12, %cst_43 {dimension_numbers = #tpu.dot_dimension_numbers<[1], [0], [0], [1], [0, 0, 1, 1], [], []>} : vector<8x32xf32>, vector<32x128xf32>, vector<8x128xf32> -> vector<8x128xf32>
    %115 = arith.addf %113, %114 : vector<8x128xf32>
    %116 = arith.negf %115 : vector<8x128xf32>
    %117 = math.exp %116 : vector<8x128xf32>
    %cst_44 = arith.constant 1.000000e+00 : f32
    %118 = vector.broadcast %cst_44 : f32 to vector<8x128xf32>
    %119 = arith.addf %118, %117 : vector<8x128xf32>
    %120 = arith.divf %118, %119 : vector<8x128xf32>
    %121 = vector.extract_strided_slice %120 {offsets = [0, 0], sizes = [8, 32], strides = [1, 1]} : vector<8x128xf32> to vector<8x32xf32>
    %122 = vector.extract_strided_slice %120 {offsets = [0, 32], sizes = [8, 32], strides = [1, 1]} : vector<8x128xf32> to vector<8x32xf32>
    %123 = vector.extract_strided_slice %120 {offsets = [0, 64], sizes = [8, 32], strides = [1, 1]} : vector<8x128xf32> to vector<8x32xf32>
    %124 = vector.extract_strided_slice %115 {offsets = [0, 96], sizes = [8, 32], strides = [1, 1]} : vector<8x128xf32> to vector<8x32xf32>
    %125 = math.tanh %124 : vector<8x32xf32>
    %126 = arith.mulf %122, %104 : vector<8x32xf32>
    %127 = arith.mulf %121, %125 : vector<8x32xf32>
    %128 = arith.addf %126, %127 : vector<8x32xf32>
    %129 = math.tanh %128 : vector<8x32xf32>
    %130 = arith.mulf %123, %129 : vector<8x32xf32>
    %131 = arith.index_cast %c4_i32 : i32 to index
    %c0_45 = arith.constant 0 : index
    %c0_46 = arith.constant 0 : index
    %132 = vector.load %arg8[%131, %c0_45, %c0_46] : memref<8x8x32xf32, #tpu.memory_space<vmem>>, vector<1x8x32xf32>
    %133 = vector.shape_cast %132 : vector<1x8x32xf32> to vector<8x32xf32>
    %134 = vector.shape_cast %130 : vector<8x32xf32> to vector<1x8x32xf32>
    tpu.vector_store %arg8[%131, %c0_45, %c0_46], %134 {strides = array<i32>} : memref<8x8x32xf32, #tpu.memory_space<vmem>>, vector<1x8x32xf32>,
    %c5_i32 = arith.constant 5 : i32
    %135 = arith.index_cast %c5_i32 : i32 to index
    %c0_47 = arith.constant 0 : index
    %c0_48 = arith.constant 0 : index
    %136 = vector.load %arg12[%135, %c0_47, %c0_48] : memref<8x8x128xf32, #tpu.memory_space<vmem>>, vector<1x8x128xf32>
    %137 = vector.shape_cast %136 : vector<1x8x128xf32> to vector<8x128xf32>
    %cst_49 = arith.constant dense<0.000000e+00> : vector<8x128xf32>
    %138 = tpu.matmul %130, %12, %cst_49 {dimension_numbers = #tpu.dot_dimension_numbers<[1], [0], [0], [1], [0, 0, 1, 1], [], []>} : vector<8x32xf32>, vector<32x128xf32>, vector<8x128xf32> -> vector<8x128xf32>
    %139 = arith.addf %137, %138 : vector<8x128xf32>
    %140 = arith.negf %139 : vector<8x128xf32>
    %141 = math.exp %140 : vector<8x128xf32>
    %cst_50 = arith.constant 1.000000e+00 : f32
    %142 = vector.broadcast %cst_50 : f32 to vector<8x128xf32>
    %143 = arith.addf %142, %141 : vector<8x128xf32>
    %144 = arith.divf %142, %143 : vector<8x128xf32>
    %145 = vector.extract_strided_slice %144 {offsets = [0, 0], sizes = [8, 32], strides = [1, 1]} : vector<8x128xf32> to vector<8x32xf32>
    %146 = vector.extract_strided_slice %144 {offsets = [0, 32], sizes = [8, 32], strides = [1, 1]} : vector<8x128xf32> to vector<8x32xf32>
    %147 = vector.extract_strided_slice %144 {offsets = [0, 64], sizes = [8, 32], strides = [1, 1]} : vector<8x128xf32> to vector<8x32xf32>
    %148 = vector.extract_strided_slice %139 {offsets = [0, 96], sizes = [8, 32], strides = [1, 1]} : vector<8x128xf32> to vector<8x32xf32>
    %149 = math.tanh %148 : vector<8x32xf32>
    %150 = arith.mulf %146, %128 : vector<8x32xf32>
    %151 = arith.mulf %145, %149 : vector<8x32xf32>
    %152 = arith.addf %150, %151 : vector<8x32xf32>
    %153 = math.tanh %152 : vector<8x32xf32>
    %154 = arith.mulf %147, %153 : vector<8x32xf32>
    %155 = arith.index_cast %c5_i32 : i32 to index
    %c0_51 = arith.constant 0 : index
    %c0_52 = arith.constant 0 : index
    %156 = vector.load %arg8[%155, %c0_51, %c0_52] : memref<8x8x32xf32, #tpu.memory_space<vmem>>, vector<1x8x32xf32>
    %157 = vector.shape_cast %156 : vector<1x8x32xf32> to vector<8x32xf32>
    %158 = vector.shape_cast %154 : vector<8x32xf32> to vector<1x8x32xf32>
    tpu.vector_store %arg8[%155, %c0_51, %c0_52], %158 {strides = array<i32>} : memref<8x8x32xf32, #tpu.memory_space<vmem>>, vector<1x8x32xf32>,
    %c6_i32 = arith.constant 6 : i32
    %159 = arith.index_cast %c6_i32 : i32 to index
    %c0_53 = arith.constant 0 : index
    %c0_54 = arith.constant 0 : index
    %160 = vector.load %arg12[%159, %c0_53, %c0_54] : memref<8x8x128xf32, #tpu.memory_space<vmem>>, vector<1x8x128xf32>
    %161 = vector.shape_cast %160 : vector<1x8x128xf32> to vector<8x128xf32>
    %cst_55 = arith.constant dense<0.000000e+00> : vector<8x128xf32>
    %162 = tpu.matmul %154, %12, %cst_55 {dimension_numbers = #tpu.dot_dimension_numbers<[1], [0], [0], [1], [0, 0, 1, 1], [], []>} : vector<8x32xf32>, vector<32x128xf32>, vector<8x128xf32> -> vector<8x128xf32>
    %163 = arith.addf %161, %162 : vector<8x128xf32>
    %164 = arith.negf %163 : vector<8x128xf32>
    %165 = math.exp %164 : vector<8x128xf32>
    %cst_56 = arith.constant 1.000000e+00 : f32
    %166 = vector.broadcast %cst_56 : f32 to vector<8x128xf32>
    %167 = arith.addf %166, %165 : vector<8x128xf32>
    %168 = arith.divf %166, %167 : vector<8x128xf32>
    %169 = vector.extract_strided_slice %168 {offsets = [0, 0], sizes = [8, 32], strides = [1, 1]} : vector<8x128xf32> to vector<8x32xf32>
    %170 = vector.extract_strided_slice %168 {offsets = [0, 32], sizes = [8, 32], strides = [1, 1]} : vector<8x128xf32> to vector<8x32xf32>
    %171 = vector.extract_strided_slice %168 {offsets = [0, 64], sizes = [8, 32], strides = [1, 1]} : vector<8x128xf32> to vector<8x32xf32>
    %172 = vector.extract_strided_slice %163 {offsets = [0, 96], sizes = [8, 32], strides = [1, 1]} : vector<8x128xf32> to vector<8x32xf32>
    %173 = math.tanh %172 : vector<8x32xf32>
    %174 = arith.mulf %170, %152 : vector<8x32xf32>
    %175 = arith.mulf %169, %173 : vector<8x32xf32>
    %176 = arith.addf %174, %175 : vector<8x32xf32>
    %177 = math.tanh %176 : vector<8x32xf32>
    %178 = arith.mulf %171, %177 : vector<8x32xf32>
    %179 = arith.index_cast %c6_i32 : i32 to index
    %c0_57 = arith.constant 0 : index
    %c0_58 = arith.constant 0 : index
    %180 = vector.load %arg8[%179, %c0_57, %c0_58] : memref<8x8x32xf32, #tpu.memory_space<vmem>>, vector<1x8x32xf32>
    %181 = vector.shape_cast %180 : vector<1x8x32xf32> to vector<8x32xf32>
    %182 = vector.shape_cast %178 : vector<8x32xf32> to vector<1x8x32xf32>
    tpu.vector_store %arg8[%179, %c0_57, %c0_58], %182 {strides = array<i32>} : memref<8x8x32xf32, #tpu.memory_space<vmem>>, vector<1x8x32xf32>,
    %c7_i32 = arith.constant 7 : i32
    %183 = arith.index_cast %c7_i32 : i32 to index
    %c0_59 = arith.constant 0 : index
    %c0_60 = arith.constant 0 : index
    %184 = vector.load %arg12[%183, %c0_59, %c0_60] : memref<8x8x128xf32, #tpu.memory_space<vmem>>, vector<1x8x128xf32>
    %185 = vector.shape_cast %184 : vector<1x8x128xf32> to vector<8x128xf32>
    %cst_61 = arith.constant dense<0.000000e+00> : vector<8x128xf32>
    %186 = tpu.matmul %178, %12, %cst_61 {dimension_numbers = #tpu.dot_dimension_numbers<[1], [0], [0], [1], [0, 0, 1, 1], [], []>} : vector<8x32xf32>, vector<32x128xf32>, vector<8x128xf32> -> vector<8x128xf32>
    %187 = arith.addf %185, %186 : vector<8x128xf32>
    %188 = arith.negf %187 : vector<8x128xf32>
    %189 = math.exp %188 : vector<8x128xf32>
    %cst_62 = arith.constant 1.000000e+00 : f32
    %190 = vector.broadcast %cst_62 : f32 to vector<8x128xf32>
    %191 = arith.addf %190, %189 : vector<8x128xf32>
    %192 = arith.divf %190, %191 : vector<8x128xf32>
    %193 = vector.extract_strided_slice %192 {offsets = [0, 0], sizes = [8, 32], strides = [1, 1]} : vector<8x128xf32> to vector<8x32xf32>
    %194 = vector.extract_strided_slice %192 {offsets = [0, 32], sizes = [8, 32], strides = [1, 1]} : vector<8x128xf32> to vector<8x32xf32>
    %195 = vector.extract_strided_slice %192 {offsets = [0, 64], sizes = [8, 32], strides = [1, 1]} : vector<8x128xf32> to vector<8x32xf32>
    %196 = vector.extract_strided_slice %187 {offsets = [0, 96], sizes = [8, 32], strides = [1, 1]} : vector<8x128xf32> to vector<8x32xf32>
    %197 = math.tanh %196 : vector<8x32xf32>
    %198 = arith.mulf %194, %176 : vector<8x32xf32>
    %199 = arith.mulf %193, %197 : vector<8x32xf32>
    %200 = arith.addf %198, %199 : vector<8x32xf32>
    %201 = math.tanh %200 : vector<8x32xf32>
    %202 = arith.mulf %195, %201 : vector<8x32xf32>
    %203 = arith.index_cast %c7_i32 : i32 to index
    %c0_63 = arith.constant 0 : index
    %c0_64 = arith.constant 0 : index
    %204 = vector.load %arg8[%203, %c0_63, %c0_64] : memref<8x8x32xf32, #tpu.memory_space<vmem>>, vector<1x8x32xf32>
    %205 = vector.shape_cast %204 : vector<1x8x32xf32> to vector<8x32xf32>
    %206 = vector.shape_cast %202 : vector<8x32xf32> to vector<1x8x32xf32>
    tpu.vector_store %arg8[%203, %c0_63, %c0_64], %206 {strides = array<i32>} : memref<8x8x32xf32, #tpu.memory_space<vmem>>, vector<1x8x32xf32>,
    %c8_i32 = arith.constant 8 : i32
    %c0_65 = arith.constant 0 : index
    %c0_66 = arith.constant 0 : index
    %207 = vector.load %arg10[%c0_65, %c0_66] : memref<8x32xf32, #tpu.memory_space<vmem>>, vector<8x32xf32>
    tpu.vector_store %arg10[%c0_65, %c0_66], %202 {strides = array<i32>} : memref<8x32xf32, #tpu.memory_space<vmem>>, vector<8x32xf32>,
    %c0_67 = arith.constant 0 : index
    %c0_68 = arith.constant 0 : index
    %208 = vector.load %arg11[%c0_67, %c0_68] : memref<8x32xf32, #tpu.memory_space<vmem>>, vector<8x32xf32>
    tpu.vector_store %arg11[%c0_67, %c0_68], %200 {strides = array<i32>} : memref<8x32xf32, #tpu.memory_space<vmem>>, vector<8x32xf32>,
    %c0_i32_69 = arith.constant 0 : i32
    %209 = arith.cmpi eq, %arg1, %c0_i32_69 : i32
    %210 = arith.extui %209 : i1 to i32
    %c0_i32_70 = arith.constant 0 : i32
    %211 = arith.cmpi ne, %210, %c0_i32_70 : i32
    scf.if %211 {
      %c0_71 = arith.constant 0 : index
      %c0_72 = arith.constant 0 : index
      %212 = vector.load %arg9[%c0_71, %c0_72] : memref<8x32xf32, #tpu.memory_space<vmem>>, vector<8x32xf32>
      tpu.vector_store %arg9[%c0_71, %c0_72], %200 {strides = array<i32>} : memref<8x32xf32, #tpu.memory_space<vmem>>, vector<8x32xf32>,
    } else {
    }
    return
  }
  func.func @transform_0(%arg0: i32, %arg1: i32) -> (i32, i32, i32) {
    %c0_i32 = arith.constant 0 : i32
    %c0_i32_0 = arith.constant 0 : i32
    return %arg1, %arg0, %c0_i32 : i32, i32, i32
  }
  func.func @transform_1(%arg0: i32, %arg1: i32) -> (i32, i32) {
    %c0_i32 = arith.constant 0 : i32
    %c0_i32_0 = arith.constant 0 : i32
    %c0_i32_1 = arith.constant 0 : i32
    return %c0_i32, %c0_i32_0 : i32, i32
  }
  func.func @transform_2(%arg0: i32, %arg1: i32) -> (i32, i32) {
    %c0_i32 = arith.constant 0 : i32
    %c0_i32_0 = arith.constant 0 : i32
    %c0_i32_1 = arith.constant 0 : i32
    return %c0_i32, %c0_i32_0 : i32, i32
  }
  func.func @transform_3(%arg0: i32, %arg1: i32) -> (i32, i32) {
    %c0_i32 = arith.constant 0 : i32
    %c0_i32_0 = arith.constant 0 : i32
    %c0_i32_1 = arith.constant 0 : i32
    return %c0_i32, %c0_i32_0 : i32, i32
  }
  func.func @transform_4(%arg0: i32, %arg1: i32) -> (i32, i32) {
    %c0_i32 = arith.constant 0 : i32
    %c0_i32_0 = arith.constant 0 : i32
    return %arg0, %c0_i32 : i32, i32
  }
  func.func @transform_5(%arg0: i32, %arg1: i32) -> (i32, i32) {
    %c0_i32 = arith.constant 0 : i32
    %c0_i32_0 = arith.constant 0 : i32
    return %arg0, %c0_i32 : i32, i32
  }
  func.func @transform_6(%arg0: i32, %arg1: i32) -> (i32, i32, i32) {
    %c0_i32 = arith.constant 0 : i32
    %c0_i32_0 = arith.constant 0 : i32
    return %arg1, %arg0, %c0_i32 : i32, i32, i32
  }
  func.func @transform_7(%arg0: i32, %arg1: i32) -> (i32, i32) {
    %c0_i32 = arith.constant 0 : i32
    %c0_i32_0 = arith.constant 0 : i32
    return %arg0, %c0_i32 : i32, i32
  }
}

</mosaic_0001>

<bundles_post_ra>
// kernel: lstm_forward.1
= control target key start
LH: loop header
LB: loop body
LE: loop exit
PB: predicated region body
PF: predicated region fallthrough
CT: control target
= control target key end

     0   :  { %v1346_v3 = vmov 0.0   ;;  %vm52_vm0 = vcmask 130048   ;;  %vm31_vm1 = vcmask 261120   ;;  %s1642_s0 = inlined_call_operand.vmem [shape: f32[8,8,16], index: 0, kind: input, shape index: {}]   ;;  %s1643_s1 = inlined_call_operand.vmem [shape: f32[16,128], index: 1, kind: input, shape index: {}]   ;;  %s1644_s2 = inlined_call_operand.vmem [shape: f32[32,128], index: 2, kind: input, shape index: {}]   ;;  %s1645_s3 = inlined_call_operand.vmem [shape: f32[1,128], index: 3, kind: input, shape index: {}]   ;;  %s1646_s4 = inlined_call_operand.vmem [shape: f32[8,32], index: 4, kind: input, shape index: {}, may-alias: {4,5}]   ;;  %s1647_s5 = inlined_call_operand.vmem [shape: f32[8,32], index: 5, kind: input, shape index: {}, may-alias: {4,5}]   ;;  %s1648_s6 = inlined_call_operand.vmem [shape: f32[8,8,32], index: 6, kind: output, shape index: {0}]   ;;  %s1649_s7 = inlined_call_operand.hbm [shape: f32[8,32], index: 7, kind: output, shape index: {1}]  }
   0x1   :  { %v44_v0 = vld [vmem:[%s1643_s1 + $0x8] sm:$0xff]  ;;  %v1398_v1 = vld [vmem:[%s1644_s2 + $0x18] sm:$0xff]  ;;  %v43_v2 = vld [vmem:[%s1643_s1] sm:$0xff]  ;;  %1166 = vmatprep.subr.mxu1 %v1346_v3 }
   0x2   :  { %1150 = vmatprep.subr.mxu0 %v44_v0  ;;  %v35_v4 = vld [vmem:[%s1642_s0] sm:$0xff]  ;;  %1167 = vmatpush3.msra.mxu1 %v1398_v1  ;;  %v1411_v5 = vld [vmem:[%s1644_s2 + $0x10] sm:$0xff]  ;;  %v36_v6 = vld [vmem:[%s1642_s0 + $0x8] sm:$0xff] }
   0x3   :  { %1151 = vmatpush3.msra.mxu0 %v44_v0  ;;  %v30_v7 = vld [vmem:[%s1646_s4] sm:$0xff]  ;;  %1168 = vmatprep.subr.mxu1 %v1346_v3 }
   0x4   :  { %1152 = vmatprep.subr.mxu0 %v43_v2  ;;  %32 = vst.msk [vmem:[#allocation2] sm:$0xff] %vm31_vm1, %v30_v7 }
   0x5   :  { %13 = vsyncpa [#allocation6], 0  ;;  %1153 = vmatpush3.msra.mxu0 %v43_v2  ;;  %1154 = vmatprep.mubr.msk.f32.mxu0 %vm52_vm0, %v35_v4  ;;  %v1425_v8 = vld [vmem:[%s1644_s2 + $0x8] sm:$0xff]  ;;  %v1433_v9 = vld [vmem:[%s1644_s2] sm:$0xff]  ;;  %vm1347_vm2 = vmmov 0   ;;  %s1348_s20 = smov 32  }
   0x6   :  { %1169 = vmatpush3.msra.mxu1 %v1411_v5  ;;  %1155 = vmatmul.mubr.msk.f32.vlgmr.msra.gmra.mxu0 %vm52_vm0, %v36_v6  ;;  %v33_v11 = vld [vmem:[%s1647_s5] sm:$0xff]  ;;  %v37_v49 = vld [vmem:[%s1642_s0 + $0x10] sm:$0xff]  ;;  %v38_v50 = vld [vmem:[%s1642_s0 + $0x18] sm:$0xff]  ;;  %s1350_s19 = smov 96   ;;  %s1351_s5 = smov [#allocation5]  }
   0x7   :  { %1170 = vmatprep.subr.mxu1 %v1346_v3  ;;  %1174 = vmatprep.mubr.msk.f32.mxu1 %vm1347_vm2, %v1346_v3  ;;  %34 = vst.msk [vmem:[#allocation3] sm:$0xff] %vm31_vm1, %v33_v11  ;;  %v1468_v13 = vld [vmem:[%s1645_s3] ss:$0 sm:$0xff]  ;;  %s1349_s3 = smov 64   ;;  %v40_v52 = vld [vmem:[%s1642_s0 + $0x28] sm:$0xff]  ;;  %v41_v53 = vld [vmem:[%s1642_s0 + $0x30] sm:$0xff] }
   0x8   :  { %1171 = vmatpush3.msra.mxu1 %v1425_v8  ;;  %1188 = vmatprep.subr.mxu0 %v1346_v3  ;;  %v39_v51 = vld [vmem:[%s1642_s0 + $0x20] sm:$0xff]  ;;  %v42_v54 = vld [vmem:[%s1642_s0 + $0x38] sm:$0xff]  ;;  %s1058_s21 = sshll.u32 %s1351_s5, 4  ;;  %s1059_s21 = int_to_ptr.vmem [resolvable:$true] %s1058_s21 }
   0x9   :  { %1172 = vmatprep.subr.mxu1 %v1346_v3  ;;  %1189 = vmatpush3.msra.mxu0 %v1398_v1  ;;  %s1324_s22 = scalar_lea.vmem %s1059_s21, 128  ;;  %p1329_p1 = scmp.lt.s32.totalorder %s1059_s21, %s1059_s21 }
   0xa   :  { %1173 = vmatpush3.msra.mxu1 %v1433_v9  ;;  %1190 = vmatprep.subr.mxu0 %v1346_v3  ;;  %p1325_p0 = scmp.ne.s32.totalorder %s1059_s21, %s1324_s22  ;;  %p1330_p2 = scmp.lt.s32.totalorder %s1324_s22, %s1324_s22 }
   0xb   :  { %v194_v10 = vld [vmem:[#allocation2] sm:$0xff]  ;;  %1177 = vmatprep.subr.mxu1 %v1346_v3  ;;  %1191 = vmatpush3.msra.mxu0 %v1411_v5 }
   0xc   :  { %1175 = vmatmul.mubr.msk.f32.vlgmr.msra.gmra.mxu1 %vm31_vm1, %v194_v10  ;;  %1192 = vmatprep.subr.mxu0 %v1346_v3  ;;  %p1331_p3 = por %p1330_p2, %p1329_p1 }
   0xd   :  { %1178 = vmatpush3.msra.mxu1 %v1398_v1  ;;  %1185 = vmatprep.mubr.msk.f32.mxu1 %vm1347_vm2, %v1346_v3 }
   0xe   :  { %1179 = vmatprep.subr.mxu1 %v1346_v3  ;;  %1193 = vmatpush3.msra.mxu0 %v1425_v8  ;;  %v195_v20 = vld [vmem:[#allocation3] sm:$0xff]  ;;  %p1332_p4 = pnand %p1331_p3, %p1325_p0 }
   0xf   :  { %1180 = vmatpush3.msra.mxu1 %v1411_v5  ;;  %1194 = vmatprep.subr.mxu0 %v1346_v3 }
  0x10   :  { %1181 = vmatprep.subr.mxu1 %v1346_v3  ;;  %1195 = vmatpush3.msra.mxu0 %v1433_v9 }
  0x11   :  { %1182 = vmatpush3.msra.mxu1 %v1425_v8  ;;  %1210 = vmatprep.subr.mxu0 %v1346_v3 }
  0x12   :  { %1183 = vmatprep.subr.mxu1 %v1346_v3  ;;  %1157 = vmatprep.mubr.msk.f32.mxu0 %vm52_vm0, %v37_v49 }
  0x13   :  { %1184 = vmatpush3.msra.mxu1 %v1433_v9  ;;  %1158 = vmatmul.mubr.msk.f32.gmra.mxu0 %vm52_vm0, %v38_v50 }
  0x14   :  { %1199 = vmatprep.subr.mxu1 %v1346_v3  ;;  %1160 = vmatprep.mubr.msk.f32.mxu0 %vm52_vm0, %v39_v51 }
  0x17   :  { %1161 = vmatmul.mubr.msk.f32.gmra.mxu0 %vm52_vm0, %v40_v52 }
  0x18   :  { %1163 = vmatprep.mubr.msk.f32.mxu0 %vm52_vm0, %v41_v53 }
  0x1b   :  { %1164 = vmatmul.mubr.msk.f32.gmra.mxu0 %vm52_vm0, %v42_v54 }
  0x1c   :  { %1196 = vmatprep.mubr.msk.f32.mxu0 %vm1347_vm2, %v1346_v3 }
  0xc6   :  { %v1156_v12 = vpop.f32.mrf.mxu0 }
  0xc7   :  { %v149_v35 = vadd.f32 %v1156_v12, %v1468_v13 }
  0xc8   :  { %v143_v14 = vpop.f32.mrf.mxu0 }
  0xc9   :  { %v144_v15 = vadd.f32 %v1468_v13, %v143_v14 }
  0xcc   :  { %v267_v16 = vpop.f32.mrf.mxu1 }
  0xcd   :  { %v271_v17 = vadd.f32 %v267_v16, %v144_v15 }
  0xce   :  { %v1176_v18 = vpop.f32.mrf.mxu1 }
  0xcf   :  { %1260 = vtanh.f32 %v271_v17  ;;  %v1078_v21 = vmul.f32 -1.442695, %v271_v17 }
  0xd1   :  { %1262 = vpow2.f32 %v1078_v21 }
  0xd3   :  { %v1159_v59 = vpop.f32.mrf.mxu0 }
  0xd5   :  { %v153_v60 = vpop.f32.mrf.mxu0 }
  0xd6   :  { %v154_v2 = vadd.f32 %v1468_v13, %v153_v60 }
  0xd7   :  { %v1537_v61 = vpop.f32.mrf.mxu0 }
  0xd9   :  { %v1539_v62 = vpop.f32.mrf.mxu0 }
  0xdb   :  { %v1541_v63 = vpop.f32.mrf.mxu0 }
  0xdc   :  { %v1261_v19 = vpop.eup %1260 }
  0xdd   :  { %285 = vrot.lane.b32.xlu0 %v1261_v19, %s1348_s20  ;;  %v1543_v0 = vpop.f32.mrf.mxu0 }
  0xde   :  { %v1263_v22 = vpop.eup %1262 }
  0xdf   :  { %v275_v23 = vadd.f32 1.0, %v1263_v22 }
  0xe1   :  { %280 = vrot.lane.b32.xlu0 %v195_v20, %s1348_s20  ;;  %1264 = vrcp.f32 %v275_v23 }
  0xee   :  { %v1265_v24 = vpop.eup %1264 }
 0x14f   :  { %v286_v25 = vpop.permute.xlu0 %285 }
 0x150   :  { %v288_v26 = vmul.f32 %v1265_v24, %v286_v25  ;;  %v159_v25 = vadd.f32 %v1159_v59, %v1468_v13 }
 0x152   :  { %290 = vrot.lane.b32.xlu1 %v288_v26, %s1348_s20 }
 0x153   :  { %v281_v27 = vpop.permute.xlu0 %280 }
 0x154   :  { %v283_v28 = vmul.f32 %v1265_v24, %v281_v27 }
 0x1c4   :  { %v291_v29 = vpop.permute.xlu1 %290 }
 0x1c5   :  { %v293_v30 = vadd.f32 %v291_v29, %v283_v28 }
 0x1c7   :  { %1266 = vtanh.f32 %v293_v30 }
 0x1d4   :  { %v1267_v31 = vpop.eup %1266 }
 0x1d5   :  { %296 = vrot.lane.b32.xlu1 %v1267_v31, %s1348_s20 }
 0x247   :  { %v297_v32 = vpop.permute.xlu1 %296 }
 0x248   :  { %v299_v33 = vmul.f32 %v1265_v24, %v297_v32 }
 0x24a   :  { %301 = vrot.lane.b32.xlu0 %v299_v33, %s1349_s3 }
 0x2bc   :  { %v302_v34 = vpop.permute.xlu0 %301 }
 0x2bd   :  { %304 = vst.msk [vmem:[%s1648_s6] sm:$0xff] %vm31_vm1, %v302_v34  ;;  %1186 = vmatmul.mubr.msk.f32.vlgmr.msra.gmra.mxu1 %vm31_vm1, %v302_v34 }
 0x2be   :  { %1200 = vmatpush3.msra.mxu1 %v1398_v1  ;;  %1207 = vmatprep.mubr.msk.f32.mxu1 %vm1347_vm2, %v1346_v3 }
 0x2bf   :  { %1201 = vmatprep.subr.mxu1 %v1346_v3 }
 0x2c0   :  { %1202 = vmatpush3.msra.mxu1 %v1411_v5 }
 0x2c1   :  { %1203 = vmatprep.subr.mxu1 %v1346_v3 }
 0x2c2   :  { %1204 = vmatpush3.msra.mxu1 %v1425_v8 }
 0x2c3   :  { %1205 = vmatprep.subr.mxu1 %v1346_v3 }
 0x2c4   :  { %1206 = vmatpush3.msra.mxu1 %v1433_v9 }
 0x2c5   :  { %1221 = vmatprep.subr.mxu1 %v1346_v3 }
 0x37d   :  { %v375_v36 = vpop.f32.mrf.mxu1 }
 0x37e   :  { %v379_v37 = vadd.f32 %v375_v36, %v149_v35 }
 0x37f   :  { %v1187_v38 = vpop.f32.mrf.mxu1 }
 0x380   :  { %1268 = vtanh.f32 %v379_v37  ;;  %v1080_v40 = vmul.f32 -1.442695, %v379_v37 }
 0x382   :  { %1270 = vpow2.f32 %v1080_v40 }
 0x38d   :  { %v1269_v39 = vpop.eup %1268 }
 0x38e   :  { %389 = vrot.lane.b32.xlu1 %v1269_v39, %s1348_s20 }
 0x38f   :  { %v1271_v41 = vpop.eup %1270 }
 0x390   :  { %v383_v42 = vadd.f32 1.0, %v1271_v41 }
 0x392   :  { %1272 = vrcp.f32 %v383_v42 }
 0x39f   :  { %v1273_v43 = vpop.eup %1272 }
 0x3a0   :  { %v387_v46 = vmul.f32 %v1273_v43, %v293_v30 }
 0x400   :  { %v390_v44 = vpop.permute.xlu1 %389 }
 0x401   :  { %v392_v45 = vmul.f32 %v1273_v43, %v390_v44 }
 0x403   :  { %394 = vrot.lane.b32.xlu0 %v392_v45, %s1348_s20 }
 0x475   :  { %v395_v47 = vpop.permute.xlu0 %394 }
 0x476   :  { %v397_v48 = vadd.f32 %v395_v47, %v387_v46 }
 0x478   :  { %1274 = vtanh.f32 %v397_v48 }
 0x485   :  { %v1275_v55 = vpop.eup %1274 }
 0x486   :  { %400 = vrot.lane.b32.xlu1 %v1275_v55, %s1348_s20 }
 0x4f8   :  { %v401_v56 = vpop.permute.xlu1 %400 }
 0x4f9   :  { %v403_v57 = vmul.f32 %v1273_v43, %v401_v56  ;;  %v164_v43 = vadd.f32 %v1468_v13, %v1539_v62  ;;  %v169_v62 = vadd.f32 %v1537_v61, %v1468_v13 }
 0x4fb   :  { %405 = vrot.lane.b32.xlu0 %v403_v57, %s1349_s3 }
 0x56d   :  { %v406_v58 = vpop.permute.xlu0 %405 }
 0x56e   :  { %1081 = vst.msk [vmem:[%s1648_s6 + $0x8] sm:$0xff] %vm31_vm1, %v406_v58  ;;  %1197 = vmatmul.mubr.msk.f32.vlgmr.msra.gmra.mxu0 %vm31_vm1, %v406_v58 }
 0x56f   :  { %1211 = vmatpush3.msra.mxu0 %v1398_v1  ;;  %1218 = vmatprep.mubr.msk.f32.mxu0 %vm1347_vm2, %v1346_v3 }
 0x570   :  { %1212 = vmatprep.subr.mxu0 %v1346_v3 }
 0x571   :  { %1213 = vmatpush3.msra.mxu0 %v1411_v5 }
 0x572   :  { %1214 = vmatprep.subr.mxu0 %v1346_v3 }
 0x573   :  { %1215 = vmatpush3.msra.mxu0 %v1425_v8 }
 0x574   :  { %1216 = vmatprep.subr.mxu0 %v1346_v3 }
 0x575   :  { %1217 = vmatpush3.msra.mxu0 %v1433_v9 }
 0x576   :  { %1232 = vmatprep.subr.mxu0 %v1346_v3 }
 0x62e   :  { %v480_v4 = vpop.f32.mrf.mxu0 }
 0x62f   :  { %v484_v6 = vadd.f32 %v480_v4, %v154_v2 }
 0x630   :  { %v1198_v7 = vpop.f32.mrf.mxu0 }
 0x631   :  { %1276 = vtanh.f32 %v484_v6  ;;  %v1083_v11 = vmul.f32 -1.442695, %v484_v6 }
 0x633   :  { %1278 = vpow2.f32 %v1083_v11 }
 0x63e   :  { %v1277_v10 = vpop.eup %1276 }
 0x63f   :  { %494 = vrot.lane.b32.xlu1 %v1277_v10, %s1348_s20 }
 0x640   :  { %v1279_v12 = vpop.eup %1278 }
 0x641   :  { %v488_v14 = vadd.f32 1.0, %v1279_v12 }
 0x643   :  { %1280 = vrcp.f32 %v488_v14 }
 0x650   :  { %v1281_v15 = vpop.eup %1280 }
 0x651   :  { %v492_v18 = vmul.f32 %v1281_v15, %v397_v48 }
 0x6b1   :  { %v495_v16 = vpop.permute.xlu1 %494 }
 0x6b2   :  { %v497_v17 = vmul.f32 %v1281_v15, %v495_v16 }
 0x6b4   :  { %499 = vrot.lane.b32.xlu0 %v497_v17, %s1348_s20 }
 0x726   :  { %v500_v19 = vpop.permute.xlu0 %499 }
 0x727   :  { %v502_v20 = vadd.f32 %v500_v19, %v492_v18  ;;  %v174_v18 = vadd.f32 %v1468_v13, %v1543_v0 }
 0x729   :  { %1282 = vtanh.f32 %v502_v20 }
 0x736   :  { %v1283_v21 = vpop.eup %1282 }
 0x737   :  { %505 = vrot.lane.b32.xlu1 %v1283_v21, %s1348_s20 }
 0x7a9   :  { %v506_v22 = vpop.permute.xlu1 %505 }
 0x7aa   :  { %v508_v23 = vmul.f32 %v1281_v15, %v506_v22 }
 0x7ac   :  { %510 = vrot.lane.b32.xlu0 %v508_v23, %s1349_s3 }
 0x81e   :  { %v511_v24 = vpop.permute.xlu0 %510 }
 0x81f   :  { %1084 = vst.msk [vmem:[%s1648_s6 + $0x10] sm:$0xff] %vm31_vm1, %v511_v24  ;;  %1208 = vmatmul.mubr.msk.f32.vlgmr.msra.gmra.mxu1 %vm31_vm1, %v511_v24 }
 0x820   :  { %1222 = vmatpush3.msra.mxu1 %v1398_v1  ;;  %1229 = vmatprep.mubr.msk.f32.mxu1 %vm1347_vm2, %v1346_v3 }
 0x821   :  { %1223 = vmatprep.subr.mxu1 %v1346_v3 }
 0x822   :  { %1224 = vmatpush3.msra.mxu1 %v1411_v5 }
 0x823   :  { %1225 = vmatprep.subr.mxu1 %v1346_v3 }
 0x824   :  { %1226 = vmatpush3.msra.mxu1 %v1425_v8 }
 0x825   :  { %1227 = vmatprep.subr.mxu1 %v1346_v3 }
 0x826   :  { %1228 = vmatpush3.msra.mxu1 %v1433_v9 }
 0x827   :  { %1243 = vmatprep.subr.mxu1 %v1346_v3 }
 0x8df   :  { %v585_v26 = vpop.f32.mrf.mxu1 }
 0x8e0   :  { %v589_v27 = vadd.f32 %v585_v26, %v159_v25 }
 0x8e1   :  { %v1209_v28 = vpop.f32.mrf.mxu1 }
 0x8e2   :  { %1284 = vtanh.f32 %v589_v27  ;;  %v1086_v30 = vmul.f32 -1.442695, %v589_v27 }
 0x8e4   :  { %1286 = vpow2.f32 %v1086_v30 }
 0x8ef   :  { %v1285_v29 = vpop.eup %1284 }
 0x8f0   :  { %599 = vrot.lane.b32.xlu1 %v1285_v29, %s1348_s20 }
 0x8f1   :  { %v1287_v31 = vpop.eup %1286 }
 0x8f2   :  { %v593_v32 = vadd.f32 1.0, %v1287_v31 }
 0x8f4   :  { %1288 = vrcp.f32 %v593_v32 }
 0x901   :  { %v1289_v33 = vpop.eup %1288 }
 0x902   :  { %v597_v36 = vmul.f32 %v1289_v33, %v502_v20 }
 0x962   :  { %v600_v34 = vpop.permute.xlu1 %599 }
 0x963   :  { %v602_v35 = vmul.f32 %v1289_v33, %v600_v34 }
 0x965   :  { %604 = vrot.lane.b32.xlu0 %v602_v35, %s1348_s20  ;;  %v179_v35 = vadd.f32 %v1541_v63, %v1468_v13 }
 0x9d7   :  { %v605_v37 = vpop.permute.xlu0 %604 }
 0x9d8   :  { %v607_v38 = vadd.f32 %v605_v37, %v597_v36 }
 0x9da   :  { %1290 = vtanh.f32 %v607_v38 }
 0x9e7   :  { %v1291_v39 = vpop.eup %1290 }
 0x9e8   :  { %610 = vrot.lane.b32.xlu1 %v1291_v39, %s1348_s20 }
 0xa5a   :  { %v611_v40 = vpop.permute.xlu1 %610 }
 0xa5b   :  { %v613_v41 = vmul.f32 %v1289_v33, %v611_v40 }
 0xa5d   :  { %615 = vrot.lane.b32.xlu0 %v613_v41, %s1349_s3 }
 0xacf   :  { %v616_v42 = vpop.permute.xlu0 %615 }
 0xad0   :  { %1087 = vst.msk [vmem:[%s1648_s6 + $0x18] sm:$0xff] %vm31_vm1, %v616_v42  ;;  %1219 = vmatmul.mubr.msk.f32.vlgmr.msra.gmra.mxu0 %vm31_vm1, %v616_v42 }
 0xad1   :  { %1233 = vmatpush3.msra.mxu0 %v1398_v1  ;;  %1240 = vmatprep.mubr.msk.f32.mxu0 %vm1347_vm2, %v1346_v3 }
 0xad2   :  { %1234 = vmatprep.subr.mxu0 %v1346_v3 }
 0xad3   :  { %1235 = vmatpush3.msra.mxu0 %v1411_v5 }
 0xad4   :  { %1236 = vmatprep.subr.mxu0 %v1346_v3 }
 0xad5   :  { %1237 = vmatpush3.msra.mxu0 %v1425_v8 }
 0xad6   :  { %1238 = vmatprep.subr.mxu0 %v1346_v3 }
 0xad7   :  { %1239 = vmatpush3.msra.mxu0 %v1433_v9 }
 0xb90   :  { %v690_v44 = vpop.f32.mrf.mxu0 }
 0xb91   :  { %v694_v45 = vadd.f32 %v690_v44, %v164_v43 }
 0xb92   :  { %v1220_v46 = vpop.f32.mrf.mxu0 }
 0xb93   :  { %1292 = vtanh.f32 %v694_v45  ;;  %v1089_v48 = vmul.f32 -1.442695, %v694_v45 }
 0xb95   :  { %1294 = vpow2.f32 %v1089_v48 }
 0xba0   :  { %v1293_v47 = vpop.eup %1292 }
 0xba1   :  { %704 = vrot.lane.b32.xlu1 %v1293_v47, %s1348_s20 }
 0xba2   :  { %v1295_v49 = vpop.eup %1294 }
 0xba3   :  { %v698_v50 = vadd.f32 1.0, %v1295_v49 }
 0xba5   :  { %1296 = vrcp.f32 %v698_v50 }
 0xbb2   :  { %v1297_v51 = vpop.eup %1296 }
 0xbb3   :  { %v702_v54 = vmul.f32 %v1297_v51, %v607_v38 }
 0xc13   :  { %v705_v52 = vpop.permute.xlu1 %704 }
 0xc14   :  { %v707_v53 = vmul.f32 %v1297_v51, %v705_v52 }
 0xc16   :  { %709 = vrot.lane.b32.xlu0 %v707_v53, %s1348_s20 }
 0xc88   :  { %v710_v55 = vpop.permute.xlu0 %709 }
 0xc89   :  { %v712_v56 = vadd.f32 %v710_v55, %v702_v54 }
 0xc8b   :  { %1298 = vtanh.f32 %v712_v56 }
 0xc98   :  { %v1299_v57 = vpop.eup %1298 }
 0xc99   :  { %715 = vrot.lane.b32.xlu1 %v1299_v57, %s1348_s20 }
 0xd0b   :  { %v716_v58 = vpop.permute.xlu1 %715 }
 0xd0c   :  { %v718_v59 = vmul.f32 %v1297_v51, %v716_v58 }
 0xd0e   :  { %720 = vrot.lane.b32.xlu0 %v718_v59, %s1349_s3 }
 0xd80   :  { %v721_v60 = vpop.permute.xlu0 %720 }
 0xd81   :  { %1090 = vst.msk [vmem:[%s1648_s6 + $0x20] sm:$0xff] %vm31_vm1, %v721_v60  ;;  %1230 = vmatmul.mubr.msk.f32.vlgmr.msra.gmra.mxu1 %vm31_vm1, %v721_v60 }
 0xd82   :  { %1244 = vmatpush3.msra.mxu1 %v1398_v1  ;;  %1251 = vmatprep.mubr.msk.f32.mxu1 %vm1347_vm2, %v1346_v3 }
 0xd83   :  { %1245 = vmatprep.subr.mxu1 %v1346_v3 }
 0xd84   :  { %1246 = vmatpush3.msra.mxu1 %v1411_v5 }
 0xd85   :  { %1247 = vmatprep.subr.mxu1 %v1346_v3 }
 0xd86   :  { %1248 = vmatpush3.msra.mxu1 %v1425_v8 }
 0xd87   :  { %1249 = vmatprep.subr.mxu1 %v1346_v3 }
 0xd88   :  { %1250 = vmatpush3.msra.mxu1 %v1433_v9 }
 0xe41   :  { %v795_v2 = vpop.f32.mrf.mxu1 }
 0xe42   :  { %v799_v1 = vadd.f32 %v795_v2, %v169_v62 }
 0xe43   :  { %v1231_v4 = vpop.f32.mrf.mxu1 }
 0xe44   :  { %1300 = vtanh.f32 %v799_v1  ;;  %v1092_v7 = vmul.f32 -1.442695, %v799_v1 }
 0xe46   :  { %1302 = vpow2.f32 %v1092_v7 }
 0xe51   :  { %v1301_v6 = vpop.eup %1300 }
 0xe52   :  { %809 = vrot.lane.b32.xlu1 %v1301_v6, %s1348_s20 }
 0xe53   :  { %v1303_v5 = vpop.eup %1302 }
 0xe54   :  { %v803_v10 = vadd.f32 1.0, %v1303_v5 }
 0xe56   :  { %1304 = vrcp.f32 %v803_v10 }
 0xe63   :  { %v1305_v8 = vpop.eup %1304 }
 0xe64   :  { %v807_v9 = vmul.f32 %v1305_v8, %v712_v56 }
 0xec4   :  { %v810_v11 = vpop.permute.xlu1 %809 }
 0xec5   :  { %v812_v3 = vmul.f32 %v1305_v8, %v810_v11 }
 0xec7   :  { %814 = vrot.lane.b32.xlu0 %v812_v3, %s1348_s20 }
 0xf39   :  { %v815_v12 = vpop.permute.xlu0 %814 }
 0xf3a   :  { %v817_v61 = vadd.f32 %v815_v12, %v807_v9 }
 0xf3c   :  { %1306 = vtanh.f32 %v817_v61 }
 0xf49   :  { %v1307_v14 = vpop.eup %1306 }
 0xf4a   :  { %820 = vrot.lane.b32.xlu1 %v1307_v14, %s1348_s20 }
 0xfbc   :  { %v821_v15 = vpop.permute.xlu1 %820 }
 0xfbd   :  { %v823_v16 = vmul.f32 %v1305_v8, %v821_v15 }
 0xfbf   :  { %825 = vrot.lane.b32.xlu0 %v823_v16, %s1349_s3 }
0x1031   :  { %v826_v17 = vpop.permute.xlu0 %825 }
0x1032   :  { %1093 = vst.msk [vmem:[%s1648_s6 + $0x28] sm:$0xff] %vm31_vm1, %v826_v17  ;;  %1241 = vmatmul.mubr.msk.f32.vlgmr.msra.gmra.mxu0 %vm31_vm1, %v826_v17 }
0x10f2   :  { %v900_v19 = vpop.f32.mrf.mxu0 }
0x10f3   :  { %v904_v20 = vadd.f32 %v900_v19, %v174_v18 }
0x10f4   :  { %v1242_v21 = vpop.f32.mrf.mxu0 }
0x10f5   :  { %1308 = vtanh.f32 %v904_v20  ;;  %v1095_v23 = vmul.f32 -1.442695, %v904_v20 }
0x10f7   :  { %1310 = vpow2.f32 %v1095_v23 }
0x1102   :  { %v1309_v22 = vpop.eup %1308 }
0x1103   :  { %914 = vrot.lane.b32.xlu1 %v1309_v22, %s1348_s20 }
0x1104   :  { %v1311_v24 = vpop.eup %1310 }
0x1105   :  { %v908_v25 = vadd.f32 1.0, %v1311_v24 }
0x1107   :  { %1312 = vrcp.f32 %v908_v25 }
0x1114   :  { %v1313_v26 = vpop.eup %1312 }
0x1115   :  { %v912_v29 = vmul.f32 %v1313_v26, %v817_v61 }
0x1175   :  { %v915_v27 = vpop.permute.xlu1 %914 }
0x1176   :  { %v917_v28 = vmul.f32 %v1313_v26, %v915_v27 }
0x1178   :  { %919 = vrot.lane.b32.xlu0 %v917_v28, %s1348_s20 }
0x11ea   :  { %v920_v30 = vpop.permute.xlu0 %919 }
0x11eb   :  { %v922_v0 = vadd.f32 %v920_v30, %v912_v29 }
0x11ed   :  { %1314 = vtanh.f32 %v922_v0 }
0x11fa   :  { %v1315_v31 = vpop.eup %1314 }
0x11fb   :  { %925 = vrot.lane.b32.xlu1 %v1315_v31, %s1348_s20 }
0x126d   :  { %v926_v32 = vpop.permute.xlu1 %925 }
0x126e   :  { %v928_v33 = vmul.f32 %v1313_v26, %v926_v32 }
0x1270   :  { %930 = vrot.lane.b32.xlu0 %v928_v33, %s1349_s3 }
0x12e2   :  { %v931_v34 = vpop.permute.xlu0 %930 }
0x12e3   :  { %1096 = vst.msk [vmem:[%s1648_s6 + $0x30] sm:$0xff] %vm31_vm1, %v931_v34  ;;  %1252 = vmatmul.mubr.msk.f32.vlgmr.msra.gmra.mxu1 %vm31_vm1, %v931_v34 }
0x13a3   :  { %v1005_v36 = vpop.f32.mrf.mxu1 }
0x13a4   :  { %v1009_v37 = vadd.f32 %v1005_v36, %v179_v35 }
0x13a5   :  { %v1253_v38 = vpop.f32.mrf.mxu1 }
0x13a6   :  { %1316 = vtanh.f32 %v1009_v37  ;;  %v1098_v40 = vmul.f32 -1.442695, %v1009_v37 }
0x13a8   :  { %1318 = vpow2.f32 %v1098_v40 }
0x13b3   :  { %v1317_v39 = vpop.eup %1316 }
0x13b4   :  { %1019 = vrot.lane.b32.xlu1 %v1317_v39, %s1348_s20 }
0x13b5   :  { %v1319_v41 = vpop.eup %1318 }
0x13b6   :  { %v1013_v42 = vadd.f32 1.0, %v1319_v41 }
0x13b8   :  { %1320 = vrcp.f32 %v1013_v42 }
0x13c5   :  { %v1321_v43 = vpop.eup %1320 }
0x13c6   :  { %v1017_v46 = vmul.f32 %v1321_v43, %v922_v0 }
0x1426   :  { %v1020_v44 = vpop.permute.xlu1 %1019 }
0x1427   :  { %v1022_v45 = vmul.f32 %v1321_v43, %v1020_v44 }
0x1429   :  { %1024 = vrot.lane.b32.xlu0 %v1022_v45, %s1348_s20 }
0x149b   :  { %v1025_v47 = vpop.permute.xlu0 %1024 }
0x149c   :  { %v1027_v13 = vadd.f32 %v1025_v47, %v1017_v46 }
0x149e   :  { %1322 = vtanh.f32 %v1027_v13  ;;  %1042 = vrot.lane.b32.xlu0 %v1027_v13, %s1350_s19 }
0x14ab   :  { %v1323_v63 = vpop.eup %1322 }
0x14ac   :  { %1030 = vrot.lane.b32.xlu1 %v1323_v63, %s1348_s20 }
0x1510   :  { %v1043_v48 = vpop.permute.xlu0 %1042 }
0x1511   :  { %1045 = vst.msk [vmem:[#allocation3] sm:$0xff] %vm31_vm1, %v1043_v48  ;;  %1049 = vst.msk [vmem:[#allocation5] sm:$0xff] %vm31_vm1, %v1043_v48 }
0x1512   :  { %1335 = shalt.err (!%p1332_p4)
}
0x1513   :  { %1061 = dma.vmem_to_hbm [thread:$0]  %s1059_s21, 128, %s1649_s7, [#allocation6]  }
0x151e   :  { %v1031_v49 = vpop.permute.xlu1 %1030 }
0x151f   :  { %v1033_v50 = vmul.f32 %v1321_v43, %v1031_v49 }
0x1521   :  { %1035 = vrot.lane.b32.xlu1 %v1033_v50, %s1349_s3 }
0x1593   :  { %v1036_v51 = vpop.permute.xlu1 %1035 }
0x1594   :  { %1099 = vst.msk [vmem:[%s1648_s6 + $0x38] sm:$0xff] %vm31_vm1, %v1036_v51  ;;  %1040 = vst.msk [vmem:[#allocation2] sm:$0xff] %vm31_vm1, %v1036_v51 }
0x1595   :  { %1344 = dma.done.wait [#allocation6], 128  }
0x1596   :  { %1345 = vsyncadd [#allocation6], 4294967168 }
0x1597   :  { %1067 = vsyncpa [#allocation6], 1 }

</bundles_post_ra>
